<compile_context>
chip_gen: v6e
topology: v6e:2x2x1
jax: 0.10.0
libtpu: 0.0.40
codegen_flags: <defaults>
</compile_context>

<pallas_src>
import jax
import jax.numpy as jnp
from jax.experimental import pallas as pl
from jax.experimental.pallas import tpu as pltpu

embedding_dim = 50  # matches the PyTorch module's constant


def skipgram_kernel(cids_ref, xids_ref, g_ref, out_ref):
    # cids_ref, xids_ref: (1, TB) int32 -- ids for this batch tile
    # g_ref:              (Vp, Vp) f32  -- Gram matrix, VMEM-resident
    # out_ref:            (1, TB) f32   -- scores for this tile (lane-dense)
    Vp = g_ref.shape[0]
    TB = cids_ref.shape[1]

    vocab_iota = jax.lax.broadcasted_iota(jnp.int32, (Vp, TB), 0)   # (Vp, TB)
    onehot_x = (vocab_iota == xids_ref[...]).astype(jnp.float32)    # (Vp, TB)
    onehot_c = (vocab_iota == cids_ref[...]).astype(jnp.float32)    # (Vp, TB)

    # tmp[v, b] = G[v, xid[b]]  -- single MXU matmul, exact f32 values.
    tmp = jnp.dot(g_ref[...], onehot_x,
                  preferred_element_type=jnp.float32,
                  precision=jax.lax.Precision.HIGHEST)              # (Vp, TB)

    # score[b] = G[cid[b], xid[b]]  (sublane select + reduce -> lane-dense row)
    out_ref[...] = jnp.sum(onehot_c * tmp, axis=0, keepdims=True)


def precompute_gram(center_table, context_table):
    """G[i, j] = <center_table[i], context_table[j]>, vocab padded to 128 lanes.

    Call once when parameters are created/updated; reuse across forward calls
    (hoists the per-call table prep out of the hot path).
    """
    V, _ = center_table.shape
    Vp = pl.cdiv(V, 128) * 128
    g = jnp.dot(center_table.astype(jnp.float32),
                context_table.astype(jnp.float32).T,
                precision=jax.lax.Precision.HIGHEST)
    return jnp.pad(g, ((0, Vp - V), (0, Vp - V)))


def skipgram_scores(center_ids, context_ids, gram, *, tile_b=2048):
    """Equivalent of SkipGramModel.forward(center_words, context_words)."""
    B = center_ids.shape[0]
    Vp = gram.shape[0]

    # Lane-aligned batch tile (multiple of 128), clamped to the padded batch.
    tile_b = max(128, pl.cdiv(tile_b, 128) * 128)
    B128 = pl.cdiv(B, 128) * 128
    TB = min(tile_b, B128)
    # Keep at least 2 grid tiles when the batch allows it so v7x's two
    # TensorCores both get work on the "parallel" axis.
    if B128 >= 2 * 128:
        TB = max(128, min(TB, (B128 // 2) // 128 * 128))
    B_pad = pl.cdiv(B, TB) * TB
    num_tiles = B_pad // TB

    # Ids as lane-dense (1, B_pad) rows (pad with 0 -- a valid row, sliced off after).
    cids = jnp.pad(center_ids.astype(jnp.int32), (0, B_pad - B)).reshape(1, B_pad)
    xids = jnp.pad(context_ids.astype(jnp.int32), (0, B_pad - B)).reshape(1, B_pad)

    grid_spec = pltpu.PrefetchScalarGridSpec(
        num_scalar_prefetch=0,
        grid=(num_tiles,),
        in_specs=[
            pl.BlockSpec((1, TB), lambda t: (0, t)),    # center ids tile
            pl.BlockSpec((1, TB), lambda t: (0, t)),    # context ids tile
            pl.BlockSpec((Vp, Vp), lambda t: (0, 0)),   # resident Gram matrix
        ],
        out_specs=pl.BlockSpec((1, TB), lambda t: (0, t)),
    )

    out = pl.pallas_call(
        skipgram_kernel,
        out_shape=jax.ShapeDtypeStruct((1, B_pad), jnp.float32),
        grid_spec=grid_spec,
        compiler_params=pltpu.CompilerParams(
            dimension_semantics=("parallel",),   # independent batch tiles
        ),
    )(cids, xids, gram)

    return out[0, :B]  # (B,) scores, same as torch.sum(ce * xe, dim=1)


if __name__ == "__main__":
    vocab_size = 64
    D = embedding_dim

    key = jax.random.PRNGKey(0)
    k_ce, k_cx, k_i1, k_i2, k_i3, k_i4 = jax.random.split(key, 6)

    # nn.init.uniform_(weight, -0.5/embedding_dim, 0.5/embedding_dim)
    bound = 0.5 / D
    center_table = jax.random.uniform(
        k_ce, (vocab_size, D), dtype=jnp.float32, minval=-bound, maxval=bound)
    context_table = jax.random.uniform(
        k_cx, (vocab_size, D), dtype=jnp.float32, minval=-bound, maxval=bound)

    # Precomputed once and reused across forward calls (perf: hoisted out of wrapper).
    gram = precompute_gram(center_table, context_table)

    def ref_scores(cw, xw):
        return jnp.sum(center_table[cw] * context_table[xw], axis=1)

    # Small batch (single grid tile).
    B1 = 8
    cw1 = jax.random.randint(k_i1, (B1,), 0, vocab_size, dtype=jnp.int32)
    xw1 = jax.random.randint(k_i2, (B1,), 0, vocab_size, dtype=jnp.int32)
    s1 = jax.block_until_ready(skipgram_scores(cw1, xw1, gram))
    assert s1.shape == (B1,)
    assert jnp.allclose(s1, ref_scores(cw1, xw1), atol=1e-6, rtol=1e-6)

    # Larger batch (multiple grid tiles + batch padding; >=2 tiles for v7x).
    B2 = 300
    cw2 = jax.random.randint(k_i3, (B2,), 0, vocab_size, dtype=jnp.int32)
    xw2 = jax.random.randint(k_i4, (B2,), 0, vocab_size, dtype=jnp.int32)
    s2 = jax.block_until_ready(skipgram_scores(cw2, xw2, gram))
    assert s2.shape == (B2,)
    assert jnp.allclose(s2, ref_scores(cw2, xw2), atol=1e-6, rtol=1e-6)

    print("KERNEL_OK")
</pallas_src>

<mosaic_0001>
module attributes {stable_mosaic.version = 11 : i64} {
  func.func @skipgram_kernel(%arg0: i32, %arg1: memref<1x128xi32, #tpu.memory_space<vmem>>, %arg2: memref<1x128xi32, #tpu.memory_space<vmem>>, %arg3: memref<128x128xf32, #tpu.memory_space<vmem>>, %arg4: memref<1x128xf32, #tpu.memory_space<vmem>>) attributes {dimension_semantics = [#tpu.dimension_semantics<parallel>], iteration_bounds = array<i64: 1>, scalar_prefetch = 0 : i64, scratch_operands = 0 : i64, tpu.core_type = #tpu.core_type<tc>, window_params = [{transform_indices = @transform_0, window_bounds = array<i64: 1, 128>}, {transform_indices = @transform_1, window_bounds = array<i64: 1, 128>}, {pipeline_mode = #tpu.pipeline_mode<synchronous>, transform_indices = @transform_2, window_bounds = array<i64: 128, 128>}, {transform_indices = @transform_3, window_bounds = array<i64: 1, 128>}]} {
    %0 = tpu.iota {dimensions = array<i32: 0>} : vector<128x128xi32>
    %c0 = arith.constant 0 : index
    %c0_0 = arith.constant 0 : index
    %1 = vector.load %arg2[%c0, %c0_0] : memref<1x128xi32, #tpu.memory_space<vmem>>, vector<1x128xi32>
    %2 = vector.broadcast %1 : vector<1x128xi32> to vector<128x128xi32>
    %3 = arith.cmpi eq, %0, %2 : vector<128x128xi32>
    %4 = arith.extui %3 : vector<128x128xi1> to vector<128x128xi32>
    %5 = arith.sitofp %4 : vector<128x128xi32> to vector<128x128xf32>
    %c0_1 = arith.constant 0 : index
    %c0_2 = arith.constant 0 : index
    %6 = vector.load %arg1[%c0_1, %c0_2] : memref<1x128xi32, #tpu.memory_space<vmem>>, vector<1x128xi32>
    %7 = vector.broadcast %6 : vector<1x128xi32> to vector<128x128xi32>
    %8 = arith.cmpi eq, %0, %7 : vector<128x128xi32>
    %9 = arith.extui %8 : vector<128x128xi1> to vector<128x128xi32>
    %10 = arith.sitofp %9 : vector<128x128xi32> to vector<128x128xf32>
    %c0_3 = arith.constant 0 : index
    %c0_4 = arith.constant 0 : index
    %11 = vector.load %arg3[%c0_3, %c0_4] : memref<128x128xf32, #tpu.memory_space<vmem>>, vector<128x128xf32>
    %cst = arith.constant dense<0.000000e+00> : vector<128x128xf32>
    %12 = tpu.matmul %11, %5, %cst {dimension_numbers = #tpu.dot_dimension_numbers<[1], [0], [0], [1], [0, 0, 1, 1], [], []>, precision = #tpu.contract_precision<fp32>} : vector<128x128xf32>, vector<128x128xf32>, vector<128x128xf32> -> vector<128x128xf32>
    %13 = arith.mulf %10, %12 : vector<128x128xf32>
    %cst_5 = arith.constant dense<0.000000e+00> : vector<128xf32>
    %14 = vector.multi_reduction <add>, %13, %cst_5 [0] : vector<128x128xf32> to vector<128xf32>
    %15 = vector.shape_cast %14 : vector<128xf32> to vector<1x128xf32>
    %c0_6 = arith.constant 0 : index
    %c0_7 = arith.constant 0 : index
    %16 = vector.load %arg4[%c0_6, %c0_7] : memref<1x128xf32, #tpu.memory_space<vmem>>, vector<1x128xf32>
    tpu.vector_store %arg4[%c0_6, %c0_7], %15 {strides = array<i32>} : memref<1x128xf32, #tpu.memory_space<vmem>>, vector<1x128xf32>,
    return
  }
  func.func @transform_0(%arg0: i32) -> (i32, i32) {
    %c0_i32 = arith.constant 0 : i32
    %c0_i32_0 = arith.constant 0 : i32
    return %c0_i32, %arg0 : i32, i32
  }
  func.func @transform_1(%arg0: i32) -> (i32, i32) {
    %c0_i32 = arith.constant 0 : i32
    %c0_i32_0 = arith.constant 0 : i32
    return %c0_i32, %arg0 : i32, i32
  }
  func.func @transform_2(%arg0: i32) -> (i32, i32) {
    %c0_i32 = arith.constant 0 : i32
    %c0_i32_0 = arith.constant 0 : i32
    %c0_i32_1 = arith.constant 0 : i32
    return %c0_i32, %c0_i32_0 : i32, i32
  }
  func.func @transform_3(%arg0: i32) -> (i32, i32) {
    %c0_i32 = arith.constant 0 : i32
    %c0_i32_0 = arith.constant 0 : i32
    return %c0_i32, %arg0 : i32, i32
  }
}

</mosaic_0001>

<bundles_post_ra>
// kernel: tpu_custom_call.1
= control target key start
LH: loop header
LB: loop body
LE: loop exit
PB: predicated region body
PF: predicated region fallthrough
CT: control target
= control target key end

     0   :  { %8 = vsyncpa [#allocation3], 0  ;;  %s3387_s0 = inlined_call_operand.hbm [shape: s32[1,128], index: 0, kind: input, shape index: {}]   ;;  %s3388_s1 = inlined_call_operand.vmem [shape: s32[1,128], index: 1, kind: input, shape index: {}]   ;;  %s3389_s2 = inlined_call_operand.hbm [shape: f32[128,128], index: 2, kind: input, shape index: {}]   ;;  %s3390_s3 = inlined_call_operand.hbm [shape: f32[1,128], index: 3, kind: output, shape index: {}]  }
   0x1   :  { %9 = vsyncpa [#allocation6], 0 }
   0x2   :  { %10 = vsyncpa [#allocation4], 0  ;;  %s2203_s12 = smov [#allocation2]   ;;  %s2204_s14 = smov [#allocation5]  }
   0x3   :  { %s17_s13 = sshll.u32 %s2203_s12, 4  ;;  %s28_s15 = sshll.u32 %s2204_s14, 4  ;;  %s18_s13 = int_to_ptr.vmem [resolvable:$true] %s17_s13  ;;  %s29_s15 = int_to_ptr.vmem [resolvable:$true] %s28_s15 }
   0x4   :  { %s2145_s16 = scalar_lea.vmem %s18_s13, 16  ;;  %s2149_s17 = scalar_lea.vmem %s18_s13, 32 }
   0x5   :  { %p2146_p0 = scmp.ne.s32.totalorder %s18_s13, %s2145_s16  ;;  %p2150_p1 = scmp.lt.s32.totalorder %s18_s13, %s18_s13 }
   0x6   :  { %p2151_p2 = scmp.lt.s32.totalorder %s2149_s17, %s2145_s16 }
   0x8   :  { %p2152_p3 = por %p2151_p2, %p2150_p1 }
   0xa   :  { %p2153_p4 = pnand %p2152_p3, %p2146_p0 }
   0xc   :  { %2156 = shalt.err (!%p2153_p4)
}
   0xd   :  { %20 = dma.hbm_to_vmem [thread:$0]  %s3387_s0, 16, %s18_s13, [#allocation3]  }
   0xe   :  { %s2165_s20 = scalar_lea.vmem %s29_s15, 2048  ;;  %p2170_p6 = scmp.lt.s32.totalorder %s29_s15, %s29_s15 }
   0xf   :  { %p2166_p5 = scmp.ne.s32.totalorder %s29_s15, %s2165_s20  ;;  %p2171_p7 = scmp.lt.s32.totalorder %s2165_s20, %s2165_s20 }
  0x11   :  { %p2172_p8 = por %p2171_p7, %p2170_p6 }
  0x13   :  { %p2173_p9 = pnand %p2172_p8, %p2166_p5 }
  0x15   :  { %2176 = shalt.err (!%p2173_p9)
}
  0x16   :  { %s2205_s21 = smov 128   ;;  %s2206_s22 = smov 8  }
  0x17   :  { %34 = dma.hbm_to_vmem [thread:$0]  %s3389_s2, 2048, %s29_s15, [#allocation6], %s2205_s21, %s2205_s21, %s2206_s22  }
  0x18   :  { %2197 = dma.done.wait [#allocation3], 16  }
  0x19   :  { %2198 = vsyncadd [#allocation3], 4294967280 }
  0x1a   :  { %2199 = dma.done.wait [#allocation6], 2048  }
  0x1b   :  { %2200 = vsyncadd [#allocation6], 4294965248  ;;  %v41_v0 = vlaneseq  ;;  %v2259_v8 = vld [vmem:[%s3388_s1] ss:$0 sm:$0xff]  ;;  %v3453_v17 = vmov 1.0   ;;  %v3395_v19 = vmov 0.0  }
  0x1c   :  { %v164_v63 = vld [vmem:[#allocation5] sm:$0xff]  ;;  %s2209_s1 = smov [#allocation7]  }
  0x1d   :  { %v2236_v1 = vshrl.u32 %v41_v0, 7  ;;  %s1510_s25 = sshll.u32 %s2209_s1, 4  ;;  %s1511_s25 = int_to_ptr.vmem [resolvable:$true] %s1510_s25 }
  0x1e   :  { %s2177_s26 = scalar_lea.vmem %s1511_s25, 16  ;;  %s2181_s27 = scalar_lea.vmem %s1511_s25, 32 }
  0x1f   :  { %3465 = vst [vmem:[#allocation11_spill] sm:$0xff] %v2236_v1  ;;  %v2239_v2 = vadd.s32 120, %v2236_v1  ;;  %v2242_v3 = vadd.s32 112, %v2236_v1  ;;  %v2245_v4 = vadd.s32 104, %v2236_v1  ;;  %v2248_v5 = vadd.s32 96, %v2236_v1  ;;  %p2178_p10 = scmp.ne.s32.totalorder %s1511_s25, %s2177_s26  ;;  %p2182_p11 = scmp.lt.s32.totalorder %s1511_s25, %s1511_s25 }
  0x20   :  { %v2251_v6 = vadd.s32 88, %v2236_v1  ;;  %v2254_v7 = vadd.s32 80, %v2236_v1  ;;  %v2262_v9 = vadd.s32 72, %v2236_v1  ;;  %v2265_v10 = vadd.s32 64, %v2236_v1  ;;  %p2183_p12 = scmp.lt.s32.totalorder %s2181_s27, %s2177_s26 }
  0x21   :  { %3466 = vst [vmem:[#allocation12_spill] sm:$0xff] %v2239_v2  ;;  %3467 = vst [vmem:[#allocation13_spill] sm:$0xff] %v2242_v3  ;;  %v2268_v11 = vadd.s32 56, %v2236_v1  ;;  %v2271_v12 = vadd.s32 48, %v2236_v1  ;;  %vm2275_vm0 = vcmp.eq.s32.totalorder %v2239_v2, %v2259_v8  ;;  %vm2281_vm1 = vcmp.eq.s32.totalorder %v2242_v3, %v2259_v8 }
  0x22   :  { %3468 = vst [vmem:[#allocation14_spill] sm:$0xff] %v2245_v4  ;;  %3469 = vst [vmem:[#allocation15_spill] sm:$0xff] %v2248_v5  ;;  %vm2287_vm2 = vcmp.eq.s32.totalorder %v2245_v4, %v2259_v8  ;;  %vm2293_vm3 = vcmp.eq.s32.totalorder %v2248_v5, %v2259_v8  ;;  %1794 = vmatprep.subr.msk.mxu0 %vm2275_vm0, %v3453_v17  ;;  %vm2302_vm4 = vcmp.eq.s32.totalorder %v2251_v6, %v2259_v8  ;;  %p2184_p13 = por %p2183_p12, %p2182_p11 }
  0x23   :  { %3470 = vst [vmem:[#allocation16_spill] sm:$0xff] %v2251_v6  ;;  %3471 = vst [vmem:[#allocation17_spill] sm:$0xff] %v2254_v7  ;;  %v1536_v20 = vsel %vm2275_vm0, 1.0, %v3395_v19  ;;  %v1535_v21 = vsel %vm2281_vm1, 1.0, %v3395_v19  ;;  %v2313_v22 = vadd.s32 40, %v2236_v1  ;;  %1795 = vmatpush3.msk.msra.mxu0 %vm2275_vm0, %v3453_v17  ;;  %vm2322_vm5 = vcmp.eq.s32.totalorder %v2254_v7, %v2259_v8 }
  0x24   :  { %3472 = vst [vmem:[#allocation18_spill] sm:$0xff] %v2262_v9  ;;  %3473 = vst [vmem:[#allocation19_spill] sm:$0xff] %v2265_v10  ;;  %v2318_v23 = vsub.f32 %v1536_v20, %v1536_v20  ;;  %v2326_v25 = vsub.f32 %v1535_v21, %v1535_v21  ;;  %v1534_v26 = vsel %vm2287_vm2, 1.0, %v3395_v19  ;;  %1796 = vmatprep.subr.msk.mxu0 %vm2281_vm1, %v3453_v17  ;;  %v1533_v29 = vsel %vm2293_vm3, 1.0, %v3395_v19  ;;  %p2185_p0 = pnand %p2184_p13, %p2178_p10 }
  0x25   :  { %3474 = vst [vmem:[#allocation20_spill] sm:$0xff] %v2268_v11  ;;  %3475 = vst [vmem:[#allocation21_spill] sm:$0xff] %v2271_v12  ;;  %vm2336_vm6 = vcmp.eq.s32.totalorder %v2262_v9, %v2259_v8  ;;  %v2340_v28 = vsub.f32 %v1534_v26, %v1534_v26  ;;  %v2346_v30 = vadd.s32 32, %v2236_v1  ;;  %1797 = vmatpush3.msk.msra.mxu0 %vm2281_vm1, %v3453_v17  ;;  %v1532_v34 = vsel %vm2302_vm4, 1.0, %v3395_v19  ;;  %v167_v9 = vld [vmem:[#allocation5 + $0x18] sm:$0xff] }
  0x26   :  { %3486 = vst [vmem:[#allocation22_spill] sm:$0xff] %v2313_v22  ;;  %v2352_v31 = vand.u32 4294901760, %v2318_v23  ;;  %v2355_v32 = vand.u32 4294901760, %v2326_v25  ;;  %v2357_v33 = vsub.f32 %v1533_v29, %v1533_v29  ;;  %1798 = vmatprep.subr.msk.mxu0 %vm2287_vm2, %v3453_v17  ;;  %vm2370_vm7 = vcmp.eq.s32.totalorder %v2265_v10, %v2259_v8 }
  0x27   :  { %3491 = vst [vmem:[#allocation23_spill] sm:$0xff] %v2346_v30  ;;  %v2366_v35 = vand.u32 4294901760, %v2340_v28  ;;  %v2374_v37 = vsub.f32 %v1532_v34, %v1532_v34  ;;  %v1531_v38 = vsel %vm2322_vm5, 1.0, %v3395_v19  ;;  %1799 = vmatpush3.msk.msra.mxu0 %vm2287_vm2, %v3453_v17  ;;  %vm2398_vm8 = vcmp.eq.s32.totalorder %v2268_v11, %v2259_v8 }
  0x28   :  { %3492 = vst [vmem:[#allocation24_spill] sm:$0xff] %v2355_v32  ;;  %v425_v39 = vsub.f32 %v2318_v23, %v2352_v31  ;;  %v432_v40 = vsub.f32 %v2326_v25, %v2355_v32  ;;  %v2387_v41 = vand.u32 4294901760, %v2357_v33  ;;  %v2389_v42 = vsub.f32 %v1531_v38, %v1531_v38  ;;  %1800 = vmatprep.subr.msk.mxu0 %vm2293_vm3, %v3453_v17 }
  0x29   :  { %3493 = vst [vmem:[#allocation25_spill] sm:$0xff] %v2366_v35  ;;  %v439_v43 = vsub.f32 %v2340_v28, %v2366_v35  ;;  %v2403_v45 = vand.u32 4294901760, %v2374_v37  ;;  %v1530_v46 = vsel %vm2336_vm6, 1.0, %v3395_v19  ;;  %1801 = vmatpush3.msk.msra.mxu0 %vm2293_vm3, %v3453_v17  ;;  %vm2421_vm9 = vcmp.eq.s32.totalorder %v2271_v12, %v2259_v8 }
  0x2a   :  { %3496 = vst [vmem:[#allocation26_spill] sm:$0xff] %v2387_v41  ;;  %v426_v47 = vand.u32 4294901760, %v425_v39  ;;  %v433_v48 = vand.u32 4294901760, %v432_v40  ;;  %v446_v49 = vsub.f32 %v2357_v33, %v2387_v41  ;;  %v2414_v50 = vand.u32 4294901760, %v2389_v42  ;;  %1802 = vmatprep.subr.msk.mxu0 %vm2302_vm4, %v3453_v17  ;;  %v165_v40 = vld [vmem:[#allocation5 + $0x8] sm:$0xff] }
  0x2b   :  { %3499 = vst [vmem:[#allocation27_spill] sm:$0xff] %v2403_v45  ;;  %v2425_v52 = vsub.f32 %v1530_v46, %v1530_v46  ;;  %v2428_v53 = vadd.s32 24, %v2236_v1  ;;  %v2431_v54 = vadd.s32 16, %v2236_v1  ;;  %1803 = vmatpush3.msk.msra.mxu0 %vm2302_vm4, %v3453_v17  ;;  %v440_v55 = vand.u32 4294901760, %v439_v43 }
  0x2c   :  { %3500 = vst [vmem:[#allocation28_spill] sm:$0xff] %v2414_v50  ;;  %1850 = vmatprep.subr.mxu1 %v426_v47  ;;  %v453_v56 = vsub.f32 %v2374_v37, %v2403_v45  ;;  %vm2440_vm10 = vcmp.eq.s32.totalorder %v2313_v22, %v2259_v8  ;;  %v1529_v58 = vsel %vm2370_vm7, 1.0, %v3395_v19  ;;  %1804 = vmatprep.subr.msk.mxu0 %vm2322_vm5, %v3453_v17  ;;  %v1528_v62 = vsel %vm2398_vm8, 1.0, %v3395_v19 }
  0x2d   :  { %3503 = vst [vmem:[#allocation29_spill] sm:$0xff] %v2428_v53  ;;  %3504 = vst [vmem:[#allocation30_spill] sm:$0xff] %v2431_v54  ;;  %1851 = vmatpush3.msra.mxu1 %v426_v47  ;;  %v460_v59 = vsub.f32 %v2389_v42, %v2414_v50  ;;  %v2453_v60 = vand.u32 4294901760, %v2425_v52  ;;  %v2455_v61 = vsub.f32 %v1529_v58, %v1529_v58  ;;  %1805 = vmatpush3.msk.msra.mxu0 %vm2322_vm5, %v3453_v17  ;;  %v3520_v7 = vmov 0.0  }
  0x2e   :  { %1852 = vmatprep.subr.mxu1 %v433_v48  ;;  %v447_v0 = vand.u32 4294901760, %v446_v49  ;;  %v2463_v20 = vsub.f32 %v1528_v62, %v1528_v62  ;;  %v1527_v21 = vsel %vm2421_vm9, 1.0, %v3395_v19  ;;  %v2469_v26 = vadd.s32 8, %v2236_v1  ;;  %1806 = vmatprep.subr.msk.mxu0 %vm2336_vm6, %v3453_v17 }
  0x2f   :  { %3507 = vst [vmem:[#allocation31_spill] sm:$0xff] %v2453_v60  ;;  %1853 = vmatpush3.msra.mxu1 %v433_v48  ;;  %v467_v29 = vsub.f32 %v2425_v52, %v2453_v60  ;;  %vm2478_vm11 = vcmp.eq.s32.totalorder %v2346_v30, %v2259_v8  ;;  %v2483_v38 = vand.u32 4294901760, %v2455_v61  ;;  %v2485_v39 = vsub.f32 %v1527_v21, %v1527_v21 }
  0x30   :  { %3508 = vst [vmem:[#allocation32_spill] sm:$0xff] %v2469_v26  ;;  %1807 = vmatpush3.msk.msra.mxu0 %vm2336_vm6, %v3453_v17  ;;  %1854 = vmatprep.subr.mxu1 %v440_v55  ;;  %v454_v43 = vand.u32 4294901760, %v453_v56  ;;  %v2491_v46 = vand.u32 4294901760, %v2463_v20  ;;  %v1526_v47 = vsel %vm2440_vm10, 1.0, %v3395_v19  ;;  %v2496_v48 = vand.u32 4294901760, %v164_v63 }
  0x31   :  { %3511 = vst [vmem:[#allocation33_spill] sm:$0xff] %v2483_v38  ;;  %1808 = vmatprep.subr.msk.mxu0 %vm2370_vm7, %v3453_v17  ;;  %1855 = vmatpush3.msra.mxu1 %v440_v55  ;;  %v461_v49 = vand.u32 4294901760, %v460_v59  ;;  %v474_v58 = vsub.f32 %v2455_v61, %v2483_v38  ;;  %vm2505_vm12 = vcmp.eq.s32.totalorder %v2428_v53, %v2259_v8  ;;  %v2515_v21 = vand.u32 4294901760, %v2485_v39  ;;  %v168_v53 = vld [vmem:[#allocation5 + $0x20] sm:$0xff] }
  0x32   :  { %3512 = vst [vmem:[#allocation34_spill] sm:$0xff] %v2491_v46  ;;  %v2509_v62 = vsub.f32 %v1526_v47, %v1526_v47  ;;  %1809 = vmatpush3.msk.msra.mxu0 %vm2370_vm7, %v3453_v17  ;;  %1856 = vmatprep.subr.mxu1 %v447_v0  ;;  %v2518_v55 = vsub.f32 %v164_v63, %v2496_v48  ;;  %v1525_v59 = vsel %vm2478_vm11, 1.0, %v3395_v19  ;;  %v2523_v2 = vand.u32 4294901760, %v165_v40  ;;  %v166_v19 = vld [vmem:[#allocation5 + $0x10] sm:$0xff] }
  0x33   :  { %3515 = vst [vmem:[#allocation35_spill] sm:$0xff] %v2515_v21  ;;  %1810 = vmatprep.subr.msk.mxu0 %vm2398_vm8, %v3453_v17  ;;  %1857 = vmatpush3.msra.mxu1 %v447_v0  ;;  %v468_v47 = vand.u32 4294901760, %v467_v29  ;;  %v481_v3 = vsub.f32 %v2463_v20, %v2491_v46  ;;  %vm2532_vm13 = vcmp.eq.s32.totalorder %v2431_v54, %v2259_v8  ;;  %v3516_v63 = vmov 0  ;;  %v171_v46 = vld [vmem:[#allocation5 + $0x38] sm:$0xff] }
  0x34   :  { %v3517_v63 = vsel %vm2532_vm13, 4294967295, %v3516_v63  ;;  %v2536_v4 = vsub.f32 %v1525_v59, %v1525_v59  ;;  %1811 = vmatpush3.msk.msra.mxu0 %vm2398_vm8, %v3453_v17  ;;  %1858 = vmatprep.subr.mxu1 %v454_v43  ;;  %v2542_v0 = vand.u32 4294901760, %v2509_v62  ;;  %v2546_v5 = vsub.f32 %v165_v40, %v2523_v2 }
  0x35   :  { %3518 = vst [vmem:[#allocation36_spill] sm:$0xff] %v3517_v63  ;;  %v1524_v6 = vsel %vm2505_vm12, 1.0, %v3520_v7  ;;  %1812 = vmatprep.subr.msk.mxu0 %vm2421_vm9, %v3453_v17  ;;  %1859 = vmatpush3.msra.mxu1 %v454_v43  ;;  %v475_v59 = vand.u32 4294901760, %v474_v58  ;;  %vm2556_vm14 = vcmp.eq.s32.totalorder %v2469_v26, %v2259_v8  ;;  %v3521_v10 = vmov 0  ;;  %v172_v63 = vld [vmem:[#allocation5 + $0x40] sm:$0xff] }
  0x36   :  { %3519 = vst [vmem:[#allocation37_spill] sm:$0xff] %v2542_v0  ;;  %v3522_v10 = vsel %vm2556_vm14, 4294967295, %v3521_v10  ;;  %v2561_v29 = vand.u32 4294901760, %v2536_v4  ;;  %v2563_v40 = vsub.f32 %v1524_v6, %v1524_v6  ;;  %1813 = vmatpush3.msk.msra.mxu0 %vm2421_vm9, %v3453_v17  ;;  %1860 = vmatprep.subr.mxu1 %v461_v49  ;;  %v488_v43 = vsub.f32 %v2485_v39, %v2515_v21  ;;  %v169_v21 = vld [vmem:[#allocation5 + $0x28] sm:$0xff] }
  0x37   :  { %3523 = vst [vmem:[#allocation38_spill] sm:$0xff] %v3522_v10  ;;  %v2571_v12 = vand.u32 4294901760, %v166_v19  ;;  %v1523_v11 = vsel %vm2532_vm13, 1.0, %v3520_v7  ;;  %1814 = vmatprep.subr.msk.mxu0 %vm2440_vm10, %v3453_v17  ;;  %1861 = vmatpush3.msra.mxu1 %v461_v49  ;;  %v482_v6 = vand.u32 4294901760, %v481_v3  ;;  %vm2581_vm15 = vcmp.eq.s32.totalorder %v2236_v1, %v2259_v8 }
  0x38   :  { %3524 = vst [vmem:[#allocation39_spill] sm:$0xff] %v2561_v29  ;;  %v2585_v22 = vsub.f32 %v1523_v11, %v1523_v11  ;;  %1815 = vmatpush3.msk.msra.mxu0 %vm2440_vm10, %v3453_v17  ;;  %1862 = vmatprep.subr.mxu1 %v468_v47  ;;  %v495_v58 = vsub.f32 %v2509_v62, %v2542_v0  ;;  %v3527_v54 = vand.u32 4294901760, %v2518_v55  ;;  %v2598_v8 = vand.u32 4294901760, %v167_v9 }
  0x39   :  { %v2596_v49 = vsub.f32 %v166_v19, %v2571_v12  ;;  %1816 = vmatprep.subr.msk.mxu0 %vm2478_vm11, %v3453_v17  ;;  %1863 = vmatpush3.msra.mxu1 %v468_v47  ;;  %v502_v11 = vsub.f32 %v2536_v4, %v2561_v29  ;;  %v2606_v1 = vand.u32 4294901760, %v2563_v40  ;;  %v489_v19 = vand.u32 4294901760, %v488_v43 }
  0x3a   :  { %v264_v3 = vsub.f32 %v2518_v55, %v3527_v54  ;;  %v1522_v54 = vsel %vm2556_vm14, 1.0, %v3520_v7  ;;  %1817 = vmatpush3.msk.msra.mxu0 %vm2478_vm11, %v3453_v17  ;;  %1864 = vmatprep.subr.mxu1 %v475_v59  ;;  %v3530_v26 = vand.u32 4294901760, %v2546_v5  ;;  %v2618_v0 = vsub.f32 %v167_v9, %v2598_v8 }
  0x3b   :  { %3528 = vst [vmem:[#allocation40_spill] sm:$0xff] %v2596_v49  ;;  %3529 = vst [vmem:[#allocation41_spill] sm:$0xff] %v2606_v1  ;;  %v2620_v29 = vsub.f32 %v1522_v54, %v1522_v54  ;;  %1818 = vmatprep.subr.msk.mxu0 %vm2505_vm12, %v3453_v17  ;;  %1865 = vmatpush3.msra.mxu1 %v475_v59  ;;  %v2627_v38 = vand.u32 4294901760, %v2585_v22  ;;  %v2629_v43 = vand.u32 4294901760, %v168_v53  ;;  %v1521_v9 = vsel %vm2581_vm15, 1.0, %v3520_v7 }
  0x3c   :  { %v274_v47 = vsub.f32 %v2546_v5, %v3530_v26  ;;  %v170_v26 = vld [vmem:[#allocation5 + $0x30] sm:$0xff]  ;;  %1819 = vmatpush3.msk.msra.mxu0 %vm2505_vm12, %v3453_v17  ;;  %1866 = vmatprep.subr.mxu1 %v482_v6  ;;  %v496_v54 = vand.u32 4294901760, %v495_v58  ;;  %v265_v60 = vand.u32 4294901760, %v264_v3  ;;  %v2637_v59 = vsub.f32 %v1521_v9, %v1521_v9 }
  0x3d   :  { %3531 = vst [vmem:[#allocation42_spill] sm:$0xff] %v2627_v38  ;;  %1820 = vmatprep.subr.msk.mxu0 %vm2532_vm13, %v3453_v17  ;;  %1867 = vmatpush3.msra.mxu1 %v482_v6  ;;  %v509_v50 = vsub.f32 %v2563_v40, %v2606_v1  ;;  %v2646_v45 = vsub.f32 %v168_v53, %v2629_v43  ;;  %v2648_v41 = vand.u32 4294901760, %v169_v21  ;;  %v503_v58 = vand.u32 4294901760, %v502_v11 }
  0x3e   :  { %1821 = vmatpush3.msk.msra.mxu0 %vm2532_vm13, %v3453_v17  ;;  %1868 = vmatprep.subr.mxu1 %v489_v19  ;;  %v275_v3 = vand.u32 4294901760, %v274_v47  ;;  %v2654_v9 = vand.u32 4294901760, %v2620_v29  ;;  %v2656_v6 = vand.u32 4294901760, %v170_v26  ;;  %v3533_v53 = vand.u32 4294901760, %v2596_v49 }
  0x3f   :  { %1822 = vmatprep.subr.msk.mxu0 %vm2556_vm14, %v3453_v17  ;;  %1869 = vmatpush3.msra.mxu1 %v489_v19  ;;  %v516_v1 = vsub.f32 %v2585_v22, %v2627_v38  ;;  %v2667_v11 = vsub.f32 %v169_v21, %v2648_v41  ;;  %v2669_v47 = vand.u32 4294901760, %v171_v46  ;;  %v2676_v19 = vand.u32 4294901760, %v2637_v59 }
  0x40   :  { %3532 = vst [vmem:[#allocation43_spill] sm:$0xff] %v2654_v9  ;;  %v284_v7 = vsub.f32 %v2596_v49, %v3533_v53  ;;  %1823 = vmatpush3.msk.msra.mxu0 %vm2556_vm14, %v3453_v17  ;;  %1870 = vmatprep.subr.mxu1 %v496_v54  ;;  %v510_v53 = vand.u32 4294901760, %v509_v50  ;;  %v3535_v21 = vand.u32 4294901760, %v2618_v0  ;;  %v523_v35 = vsub.f32 %v2620_v29, %v2654_v9  ;;  %v174_v9 = vld [vmem:[#allocation5 + $0x50] sm:$0xff] }
  0x41   :  { %3534 = vst [vmem:[#allocation44_spill] sm:$0xff] %v2676_v19  ;;  %1824 = vmatprep.subr.msk.mxu0 %vm2581_vm15, %v3453_v17  ;;  %1871 = vmatpush3.msra.mxu1 %v496_v54  ;;  %v2691_v49 = vsub.f32 %v170_v26, %v2656_v6  ;;  %v173_v54 = vld [vmem:[#allocation5 + $0x48] sm:$0xff]  ;;  %v517_v32 = vand.u32 4294901760, %v516_v1  ;;  %v530_v10 = vsub.f32 %v2637_v59, %v2676_v19  ;;  %v2702_v26 = vand.u32 4294901760, %v172_v63 }
  0x42   :  { %v294_v38 = vsub.f32 %v2618_v0, %v3535_v21  ;;  %1825 = vmatpush3.msk.msra.mxu0 %vm2581_vm15, %v3453_v17  ;;  %1826 = vmatprep.mubr.f32.mxu0 %v265_v60  ;;  %v285_v50 = vand.u32 4294901760, %v284_v7  ;;  %v2694_v21 = vsub.f32 %v171_v46, %v2669_v47  ;;  %v3536_v60 = vand.u32 4294901760, %v2646_v45 }
  0x43   :  { %1872 = vmatprep.subr.mxu1 %v503_v58  ;;  %1827 = vmatmul.mubr.f32.vlgmr.msra.gmra.mxu0 %v275_v3  ;;  %v2705_v1 = vand.u32 4294901760, %v173_v54  ;;  %v524_v46 = vand.u32 4294901760, %v523_v35  ;;  %v175_v35 = vld [vmem:[#allocation5 + $0x58] sm:$0xff]  ;;  %v3551_v13 = vand.u32 4294901760, %v2618_v0  ;;  %v3553_v14 = vand.u32 4294901760, %v2646_v45 }
  0x44   :  { %1873 = vmatpush3.msra.mxu1 %v503_v58  ;;  %1906 = vmatprep.subr.mxu0 %v2318_v23  ;;  %v304_v17 = vsub.f32 %v2646_v45, %v3536_v60  ;;  %v295_v7 = vand.u32 4294901760, %v294_v38  ;;  %v3537_v58 = vand.u32 4294901760, %v2667_v11  ;;  %v3463_v60 = vand.u32 4294901760, %v2691_v49 }
  0x45   :  { %1874 = vmatprep.subr.mxu1 %v510_v53  ;;  %1907 = vmatpush3.msra.mxu0 %v2318_v23  ;;  %v3459_v19 = vand.u32 4294901760, %v2694_v21  ;;  %v531_v38 = vand.u32 4294901760, %v530_v10  ;;  %v3555_v15 = vand.u32 4294901760, %v2667_v11  ;;  %v3557_v16 = vand.u32 4294901760, %v2691_v49 }
  0x46   :  { %1875 = vmatpush3.msra.mxu1 %v510_v53  ;;  %1908 = vmatprep.subr.mxu0 %v2326_v25  ;;  %v314_v3 = vsub.f32 %v2667_v11, %v3537_v58  ;;  %v305_v23 = vand.u32 4294901760, %v304_v17  ;;  %v2715_v53 = vsub.f32 %v172_v63, %v2702_v26  ;;  %v2719_v58 = vsub.f32 %v173_v54, %v2705_v1  ;;  %v176_v54 = vld [vmem:[#allocation5 + $0x60] sm:$0xff] }
  0x47   :  { %1829 = vmatprep.mubr.f32.mxu0 %v285_v50  ;;  %1876 = vmatprep.subr.mxu1 %v517_v32  ;;  %v2725_v17 = vand.u32 4294901760, %v174_v9  ;;  %v334_v10 = vsub.f32 %v2694_v21, %v3459_v19  ;;  %v3559_v18 = vand.u32 4294901760, %v2694_v21 }
  0x48   :  { %1909 = vmatpush3.msra.mxu0 %v2326_v25  ;;  %1877 = vmatpush3.msra.mxu1 %v517_v32  ;;  %v315_v50 = vand.u32 4294901760, %v314_v3  ;;  %v324_v25 = vsub.f32 %v2691_v49, %v3463_v60  ;;  %v2731_v32 = vand.u32 4294901760, %v175_v35  ;;  %v3460_v63 = vand.u32 4294901760, %v2719_v58  ;;  %v177_v3 = vld [vmem:[#allocation5 + $0x68] sm:$0xff] }
  0x49   :  { %1830 = vmatmul.mubr.f32.gmra.mxu0 %v295_v7  ;;  %1910 = vmatprep.subr.mxu0 %v2340_v28  ;;  %v3561_v24 = vand.u32 4294901760, %v2715_v53  ;;  %v3563_v27 = vand.u32 4294901760, %v2719_v58 }
  0x4a   :  { %1878 = vmatprep.subr.mxu1 %v524_v46  ;;  %1911 = vmatpush3.msra.mxu0 %v2340_v28  ;;  %v3461_v28 = vand.u32 4294901760, %v2715_v53  ;;  %v325_v7 = vand.u32 4294901760, %v324_v25  ;;  %v2743_v19 = vsub.f32 %v175_v35, %v2731_v32  ;;  %v2761_v35 = vand.u32 4294901760, %v177_v3 }
  0x4b   :  { %1879 = vmatpush3.msra.mxu1 %v524_v46  ;;  %1912 = vmatprep.subr.mxu0 %v2357_v33  ;;  %v2738_v46 = vsub.f32 %v174_v9, %v2725_v17 }
  0x4c   :  { %1832 = vmatprep.mubr.f32.mxu0 %v305_v23  ;;  %1880 = vmatprep.subr.mxu1 %v531_v38  ;;  %v335_v23 = vand.u32 4294901760, %v334_v10  ;;  %v344_v9 = vsub.f32 %v2715_v53, %v3461_v28  ;;  %v3464_v25 = vand.u32 4294901760, %v2743_v19  ;;  %v178_v10 = vld [vmem:[#allocation5 + $0x70] sm:$0xff]  ;;  %v3567_v44 = vand.u32 4294901760, %v2743_v19 }
  0x4d   :  { %1913 = vmatpush3.msra.mxu0 %v2357_v33  ;;  %1881 = vmatpush3.msra.mxu1 %v531_v38  ;;  %v3538_v33 = vmov 1.0   ;;  %v2752_v38 = vand.u32 4294901760, %v176_v54  ;;  %v3565_v36 = vand.u32 4294901760, %v2738_v46 }
  0x4e   :  { %1833 = vmatmul.mubr.f32.gmra.mxu0 %v315_v50  ;;  %1882 = vmatprep.mubr.f32.mxu1 %v2496_v48  ;;  %v3462_v50 = vand.u32 4294901760, %v2738_v46 }
  0x4f   :  { %1914 = vmatprep.subr.mxu0 %v2374_v37  ;;  %1883 = vmatmul.mubr.f32.vlgmr.msra.gmra.mxu1 %v2523_v2  ;;  %v2772_v28 = vsub.f32 %v176_v54, %v2752_v38 }
  0x50   :  { %1915 = vmatpush3.msra.mxu0 %v2374_v37  ;;  %1962 = vmatprep.subr.msk.mxu1 %vm2275_vm0, %v3538_v33  ;;  %v354_v37 = vsub.f32 %v2719_v58, %v3460_v63  ;;  %v345_v63 = vand.u32 4294901760, %v344_v9  ;;  %v364_v54 = vsub.f32 %v2738_v46, %v3462_v50  ;;  %v2788_v9 = vand.u32 4294901760, %v178_v10 }
  0x51   :  { %1916 = vmatprep.subr.mxu0 %v2389_v42  ;;  %1963 = vmatpush3.msk.msra.mxu1 %vm2275_vm0, %v3538_v33 }
  0x52   :  { %1835 = vmatprep.mubr.f32.mxu0 %v325_v7  ;;  %1917 = vmatpush3.msra.mxu0 %v2389_v42  ;;  %v179_v7 = vld [vmem:[#allocation5 + $0x78] sm:$0xff]  ;;  %v355_v42 = vand.u32 4294901760, %v354_v37  ;;  %v383_v37 = vand.u32 4294901760, %v2772_v28  ;;  %v365_v60 = vand.u32 4294901760, %v364_v54 }
  0x53   :  { %1964 = vmatprep.subr.msk.mxu1 %vm2281_vm1, %v3538_v33  ;;  %1836 = vmatmul.mubr.f32.gmra.mxu0 %v335_v23  ;;  %v2779_v23 = vsub.f32 %v177_v3, %v2761_v35  ;;  %v2797_v3 = vand.u32 4294901760, %v179_v7 }
  0x54   :  { %1885 = vmatprep.mubr.f32.mxu1 %v2571_v12  ;;  %1918 = vmatprep.subr.mxu0 %v2425_v52 }
  0x55   :  { %1965 = vmatpush3.msk.msra.mxu1 %vm2281_vm1, %v3538_v33  ;;  %1919 = vmatpush3.msra.mxu0 %v2425_v52  ;;  %v374_v52 = vsub.f32 %v2743_v19, %v3464_v25  ;;  %v393_v50 = vand.u32 4294901760, %v2779_v23  ;;  %v2808_v25 = vsub.f32 %v178_v10, %v2788_v9  ;;  %v384_v10 = vsub.f32 %v2772_v28, %v383_v37 }
  0x56   :  { %1886 = vmatmul.mubr.f32.gmra.mxu1 %v2598_v8  ;;  %1966 = vmatprep.subr.msk.mxu1 %vm2287_vm2, %v3538_v33 }
  0x57   :  { %1920 = vmatprep.subr.mxu0 %v2455_v61  ;;  %1967 = vmatpush3.msk.msra.mxu1 %vm2287_vm2, %v3538_v33  ;;  %v385_v54 = vand.u32 4294901760, %v384_v10  ;;  %v3545_v10 = vand.u32 4294901760, %v2518_v55 }
  0x58   :  { %1838 = vmatprep.mubr.f32.mxu0 %v345_v63  ;;  %1921 = vmatpush3.msra.mxu0 %v2455_v61  ;;  %v375_v61 = vand.u32 4294901760, %v374_v52  ;;  %v2815_v63 = vsub.f32 %v179_v7, %v2797_v3  ;;  %v403_v7 = vand.u32 4294901760, %v2808_v25 }
  0x59   :  { %1968 = vmatprep.subr.msk.mxu1 %vm2293_vm3, %v3538_v33  ;;  %1839 = vmatmul.mubr.f32.gmra.mxu0 %v355_v42 }
  0x5a   :  { %1888 = vmatprep.mubr.f32.mxu1 %v2629_v43  ;;  %1922 = vmatprep.subr.mxu0 %v2463_v20  ;;  %v413_v42 = vand.u32 4294901760, %v2815_v63 }
  0x5b   :  { %1969 = vmatpush3.msk.msra.mxu1 %vm2293_vm3, %v3538_v33  ;;  %1923 = vmatpush3.msra.mxu0 %v2463_v20  ;;  %v394_v20 = vsub.f32 %v2779_v23, %v393_v50 }
  0x5c   :  { %1889 = vmatmul.mubr.f32.gmra.mxu1 %v2648_v41  ;;  %1970 = vmatprep.subr.msk.mxu1 %vm2302_vm4, %v3538_v33 }
  0x5d   :  { %1924 = vmatprep.subr.mxu0 %v2485_v39  ;;  %1971 = vmatpush3.msk.msra.mxu1 %vm2302_vm4, %v3538_v33 }
  0x5e   :  { %1841 = vmatprep.mubr.f32.mxu0 %v365_v60  ;;  %1925 = vmatpush3.msra.mxu0 %v2485_v39  ;;  %v395_v39 = vand.u32 4294901760, %v394_v20  ;;  %v404_v60 = vsub.f32 %v2808_v25, %v403_v7  ;;  %v3546_v20 = vld [vmem:[#allocation27_spill] sm:$0xff] }
  0x5f   :  { %1972 = vmatprep.subr.msk.mxu1 %vm2322_vm5, %v3538_v33  ;;  %1842 = vmatmul.mubr.f32.gmra.mxu0 %v375_v61 }
  0x60   :  { %1891 = vmatprep.mubr.f32.mxu1 %v2656_v6  ;;  %1926 = vmatprep.subr.mxu0 %v2509_v62  ;;  %v405_v52 = vand.u32 4294901760, %v404_v60  ;;  %v3552_v60 = vld [vmem:[#allocation33_spill] sm:$0xff] }
  0x61   :  { %1973 = vmatpush3.msk.msra.mxu1 %vm2322_vm5, %v3538_v33  ;;  %1927 = vmatpush3.msra.mxu0 %v2509_v62  ;;  %v414_v62 = vsub.f32 %v2815_v63, %v413_v42 }
  0x62   :  { %1892 = vmatmul.mubr.f32.gmra.mxu1 %v2669_v47  ;;  %1974 = vmatprep.subr.msk.mxu1 %vm2336_vm6, %v3538_v33 }
  0x63   :  { %1928 = vmatprep.subr.mxu0 %v2536_v4  ;;  %1975 = vmatpush3.msk.msra.mxu1 %vm2336_vm6, %v3538_v33  ;;  %v415_v61 = vand.u32 4294901760, %v414_v62  ;;  %v3556_v62 = vld [vmem:[#allocation35_spill] sm:$0xff] }
  0x64   :  { %1844 = vmatprep.mubr.f32.mxu0 %v385_v54  ;;  %1929 = vmatpush3.msra.mxu0 %v2536_v4  ;;  %v3539_v4 = vld [vmem:[#allocation24_spill] sm:$0xff]  ;;  %v3547_v54 = vand.u32 4294901760, %v2546_v5 }
  0x65   :  { %1976 = vmatprep.subr.msk.mxu1 %vm2370_vm7, %v3538_v33  ;;  %1845 = vmatmul.mubr.f32.gmra.mxu0 %v395_v39  ;;  %v3548_v39 = vld [vmem:[#allocation28_spill] sm:$0xff] }
  0x66   :  { %1894 = vmatprep.mubr.f32.mxu1 %v2702_v26  ;;  %1930 = vmatprep.subr.mxu0 %v2563_v40 }
  0x67   :  { %1977 = vmatpush3.msk.msra.mxu1 %vm2370_vm7, %v3538_v33  ;;  %1931 = vmatpush3.msra.mxu0 %v2563_v40 }
  0x68   :  { %1895 = vmatmul.mubr.f32.gmra.mxu1 %v2705_v1  ;;  %1978 = vmatprep.subr.msk.mxu1 %vm2398_vm8, %v3538_v33 }
  0x69   :  { %1932 = vmatprep.subr.mxu0 %v2585_v22  ;;  %1979 = vmatpush3.msk.msra.mxu1 %vm2398_vm8, %v3538_v33 }
  0x6a   :  { %1847 = vmatprep.mubr.f32.mxu0 %v405_v52  ;;  %1933 = vmatpush3.msra.mxu0 %v2585_v22  ;;  %v3540_v22 = vld [vmem:[#allocation40_spill] sm:$0xff] }
  0x6b   :  { %1980 = vmatprep.subr.msk.mxu1 %vm2421_vm9, %v3538_v33  ;;  %1848 = vmatmul.mubr.f32.gmra.mxu0 %v415_v61 }
  0x6c   :  { %1897 = vmatprep.mubr.f32.mxu1 %v2725_v17  ;;  %1934 = vmatprep.subr.mxu0 %v2620_v29 }
  0x6d   :  { %1981 = vmatpush3.msk.msra.mxu1 %vm2421_vm9, %v3538_v33  ;;  %1935 = vmatpush3.msra.mxu0 %v2620_v29 }
  0x6e   :  { %1898 = vmatmul.mubr.f32.gmra.mxu1 %v2731_v32  ;;  %1982 = vmatprep.subr.msk.mxu1 %vm2440_vm10, %v3538_v33 }
  0x6f   :  { %1936 = vmatprep.subr.mxu0 %v2637_v59  ;;  %1983 = vmatpush3.msk.msra.mxu1 %vm2440_vm10, %v3538_v33 }
  0x70   :  { %1937 = vmatpush3.msra.mxu0 %v2637_v59  ;;  %1938 = vmatprep.mubr.f32.mxu0 %v2518_v55  ;;  %v3544_v59 = vld [vmem:[#allocation26_spill] sm:$0xff]  ;;  %v3550_v55 = vld [vmem:[#allocation31_spill] sm:$0xff] }
  0x71   :  { %1984 = vmatprep.subr.msk.mxu1 %vm2478_vm11, %v3538_v33  ;;  %1900 = vmatprep.mubr.f32.mxu1 %v2752_v38 }
  0x72   :  { %1939 = vmatmul.mubr.f32.vlgmr.msra.gmra.mxu0 %v2546_v5  ;;  %1985 = vmatpush3.msk.msra.mxu1 %vm2478_vm11, %v3538_v33  ;;  %v3549_v5 = vand.u32 4294901760, %v3540_v22 }
  0x73   :  { %2018 = vmatprep.subr.mxu0 %v2352_v31  ;;  %1901 = vmatmul.mubr.f32.gmra.mxu1 %v2761_v35 }
  0x74   :  { %1986 = vmatprep.subr.msk.mxu1 %vm2505_vm12, %v3538_v33  ;;  %2019 = vmatpush3.msra.mxu0 %v2352_v31  ;;  %v3542_v31 = vld [vmem:[#allocation25_spill] sm:$0xff] }
  0x75   :  { %1987 = vmatpush3.msk.msra.mxu1 %vm2505_vm12, %v3538_v33  ;;  %2020 = vmatprep.subr.mxu0 %v3539_v4 }
  0x76   :  { %1941 = vmatprep.mubr.f32.mxu0 %v3540_v22  ;;  %1988 = vmatprep.subr.msk.mxu1 %vm2532_vm13, %v3538_v33 }
  0x77   :  { %2021 = vmatpush3.msra.mxu0 %v3539_v4  ;;  %1903 = vmatprep.mubr.f32.mxu1 %v2788_v9 }
  0x78   :  { %1942 = vmatmul.mubr.f32.gmra.mxu0 %v2618_v0  ;;  %1989 = vmatpush3.msk.msra.mxu1 %vm2532_vm13, %v3538_v33  ;;  %v3554_v0 = vld [vmem:[#allocation34_spill] sm:$0xff] }
  0x79   :  { %2022 = vmatprep.subr.mxu0 %v3542_v31  ;;  %1904 = vmatmul.mubr.f32.gmra.mxu1 %v2797_v3 }
  0x7a   :  { %1990 = vmatprep.subr.msk.mxu1 %vm2556_vm14, %v3538_v33  ;;  %2023 = vmatpush3.msra.mxu0 %v3542_v31 }
  0x7b   :  { %1991 = vmatpush3.msk.msra.mxu1 %vm2556_vm14, %v3538_v33  ;;  %2024 = vmatprep.subr.mxu0 %v3544_v59 }
  0x7c   :  { %1944 = vmatprep.mubr.f32.mxu0 %v2646_v45  ;;  %1992 = vmatprep.subr.msk.mxu1 %vm2581_vm15, %v3538_v33  ;;  %v3558_v45 = vld [vmem:[#allocation37_spill] sm:$0xff] }
  0x7d   :  { %2025 = vmatpush3.msra.mxu0 %v3544_v59  ;;  %1993 = vmatpush3.msk.msra.mxu1 %vm2581_vm15, %v3538_v33 }
  0x7e   :  { %1945 = vmatmul.mubr.f32.gmra.mxu0 %v2667_v11  ;;  %1994 = vmatprep.mubr.f32.mxu1 %v3545_v10  ;;  %v3560_v11 = vld [vmem:[#allocation39_spill] sm:$0xff] }
  0x7f   :  { %2026 = vmatprep.subr.mxu0 %v3546_v20  ;;  %1995 = vmatmul.mubr.f32.vlgmr.msra.gmra.mxu1 %v3547_v54 }
  0x80   :  { %2027 = vmatpush3.msra.mxu0 %v3546_v20  ;;  %2074 = vmatprep.subr.msk.mxu1 %vm2275_vm0, %v3538_v33 }
  0x81   :  { %2028 = vmatprep.subr.mxu0 %v3548_v39  ;;  %2075 = vmatpush3.msk.msra.mxu1 %vm2275_vm0, %v3538_v33 }
  0x82   :  { %1947 = vmatprep.mubr.f32.mxu0 %v2691_v49  ;;  %2029 = vmatpush3.msra.mxu0 %v3548_v39  ;;  %v3562_v49 = vld [vmem:[#allocation41_spill] sm:$0xff] }
  0x83   :  { %2076 = vmatprep.subr.msk.mxu1 %vm2281_vm1, %v3538_v33  ;;  %1948 = vmatmul.mubr.f32.gmra.mxu0 %v2694_v21  ;;  %v3564_v21 = vld [vmem:[#allocation42_spill] sm:$0xff] }
  0x84   :  { %1997 = vmatprep.mubr.f32.mxu1 %v3549_v5  ;;  %2030 = vmatprep.subr.mxu0 %v3550_v55 }
  0x85   :  { %2077 = vmatpush3.msk.msra.mxu1 %vm2281_vm1, %v3538_v33  ;;  %2031 = vmatpush3.msra.mxu0 %v3550_v55 }
  0x86   :  { %1998 = vmatmul.mubr.f32.gmra.mxu1 %v3551_v13  ;;  %2078 = vmatprep.subr.msk.mxu1 %vm2287_vm2, %v3538_v33 }
  0x87   :  { %2032 = vmatprep.subr.mxu0 %v3552_v60  ;;  %2079 = vmatpush3.msk.msra.mxu1 %vm2287_vm2, %v3538_v33 }
  0x88   :  { %1950 = vmatprep.mubr.f32.mxu0 %v2715_v53  ;;  %2033 = vmatpush3.msra.mxu0 %v3552_v60  ;;  %v3566_v53 = vld [vmem:[#allocation43_spill] sm:$0xff] }
  0x89   :  { %2080 = vmatprep.subr.msk.mxu1 %vm2293_vm3, %v3538_v33  ;;  %1951 = vmatmul.mubr.f32.gmra.mxu0 %v2719_v58  ;;  %v3568_v58 = vld [vmem:[#allocation44_spill] sm:$0xff] }
  0x8a   :  { %2000 = vmatprep.mubr.f32.mxu1 %v3553_v14  ;;  %2034 = vmatprep.subr.mxu0 %v3554_v0 }
  0x8b   :  { %2081 = vmatpush3.msk.msra.mxu1 %vm2293_vm3, %v3538_v33  ;;  %2035 = vmatpush3.msra.mxu0 %v3554_v0 }
  0x8c   :  { %2001 = vmatmul.mubr.f32.gmra.mxu1 %v3555_v15  ;;  %2082 = vmatprep.subr.msk.mxu1 %vm2302_vm4, %v3538_v33 }
  0x8d   :  { %2036 = vmatprep.subr.mxu0 %v3556_v62  ;;  %2083 = vmatpush3.msk.msra.mxu1 %vm2302_vm4, %v3538_v33 }
  0x8e   :  { %1953 = vmatprep.mubr.f32.mxu0 %v2738_v46  ;;  %2037 = vmatpush3.msra.mxu0 %v3556_v62 }
  0x8f   :  { %2084 = vmatprep.subr.msk.mxu1 %vm2322_vm5, %v3538_v33  ;;  %1954 = vmatmul.mubr.f32.gmra.mxu0 %v2743_v19 }
  0x90   :  { %2003 = vmatprep.mubr.f32.mxu1 %v3557_v16  ;;  %2038 = vmatprep.subr.mxu0 %v3558_v45 }
  0x91   :  { %2085 = vmatpush3.msk.msra.mxu1 %vm2322_vm5, %v3538_v33  ;;  %2039 = vmatpush3.msra.mxu0 %v3558_v45 }
  0x92   :  { %2004 = vmatmul.mubr.f32.gmra.mxu1 %v3559_v18  ;;  %2086 = vmatprep.subr.msk.mxu1 %vm2336_vm6, %v3538_v33 }
  0x93   :  { %2040 = vmatprep.subr.mxu0 %v3560_v11  ;;  %2087 = vmatpush3.msk.msra.mxu1 %vm2336_vm6, %v3538_v33 }
  0x94   :  { %1956 = vmatprep.mubr.f32.mxu0 %v2772_v28  ;;  %2041 = vmatpush3.msra.mxu0 %v3560_v11 }
  0x95   :  { %2088 = vmatprep.subr.msk.mxu1 %vm2370_vm7, %v3538_v33  ;;  %1957 = vmatmul.mubr.f32.gmra.mxu0 %v2779_v23 }
  0x96   :  { %2006 = vmatprep.mubr.f32.mxu1 %v3561_v24  ;;  %2042 = vmatprep.subr.mxu0 %v3562_v49 }
  0x97   :  { %2089 = vmatpush3.msk.msra.mxu1 %vm2370_vm7, %v3538_v33  ;;  %2043 = vmatpush3.msra.mxu0 %v3562_v49 }
  0x98   :  { %2007 = vmatmul.mubr.f32.gmra.mxu1 %v3563_v27  ;;  %2090 = vmatprep.subr.msk.mxu1 %vm2398_vm8, %v3538_v33 }
  0x99   :  { %2044 = vmatprep.subr.mxu0 %v3564_v21  ;;  %2091 = vmatpush3.msk.msra.mxu1 %vm2398_vm8, %v3538_v33 }
  0x9a   :  { %1959 = vmatprep.mubr.f32.mxu0 %v2808_v25  ;;  %2045 = vmatpush3.msra.mxu0 %v3564_v21 }
  0x9b   :  { %2092 = vmatprep.subr.msk.mxu1 %vm2421_vm9, %v3538_v33  ;;  %1960 = vmatmul.mubr.f32.gmra.mxu0 %v2815_v63 }
  0x9c   :  { %2009 = vmatprep.mubr.f32.mxu1 %v3565_v36  ;;  %2046 = vmatprep.subr.mxu0 %v3566_v53 }
  0x9d   :  { %2093 = vmatpush3.msk.msra.mxu1 %vm2421_vm9, %v3538_v33  ;;  %2047 = vmatpush3.msra.mxu0 %v3566_v53 }
  0x9e   :  { %2010 = vmatmul.mubr.f32.gmra.mxu1 %v3567_v44  ;;  %2094 = vmatprep.subr.msk.mxu1 %vm2440_vm10, %v3538_v33  ;;  %v3238_v44 = vld [vmem:[#allocation2] ss:$0 sm:$0xff] }
  0x9f   :  { %2048 = vmatprep.subr.mxu0 %v3568_v58  ;;  %2095 = vmatpush3.msk.msra.mxu1 %vm2440_vm10, %v3538_v33 }
  0xa0   :  { %2049 = vmatpush3.msra.mxu0 %v3568_v58  ;;  %2050 = vmatprep.mubr.f32.mxu0 %v2496_v48 }
  0xa1   :  { %2096 = vmatprep.subr.msk.mxu1 %vm2478_vm11, %v3538_v33  ;;  %2012 = vmatprep.mubr.f32.mxu1 %v383_v37 }
  0xa2   :  { %2051 = vmatmul.mubr.f32.vlgmr.msra.gmra.mxu0 %v2523_v2  ;;  %2097 = vmatpush3.msk.msra.mxu1 %vm2478_vm11, %v3538_v33 }
  0xa3   :  { %2013 = vmatmul.mubr.f32.gmra.mxu1 %v393_v50  ;;  %2098 = vmatprep.subr.msk.mxu1 %vm2505_vm12, %v3538_v33 }
  0xa4   :  { %2099 = vmatpush3.msk.msra.mxu1 %vm2505_vm12, %v3538_v33  ;;  %2053 = vmatprep.mubr.f32.mxu0 %v2571_v12 }
  0xa5   :  { %2100 = vmatprep.subr.msk.mxu1 %vm2532_vm13, %v3538_v33  ;;  %2015 = vmatprep.mubr.f32.mxu1 %v403_v7 }
  0xa6   :  { %2054 = vmatmul.mubr.f32.gmra.mxu0 %v2598_v8  ;;  %2101 = vmatpush3.msk.msra.mxu1 %vm2532_vm13, %v3538_v33 }
  0xa7   :  { %2016 = vmatmul.mubr.f32.gmra.mxu1 %v413_v42  ;;  %2102 = vmatprep.subr.msk.mxu1 %vm2556_vm14, %v3538_v33 }
  0xa8   :  { %2103 = vmatpush3.msk.msra.mxu1 %vm2556_vm14, %v3538_v33  ;;  %2056 = vmatprep.mubr.f32.mxu0 %v2629_v43 }
  0xa9   :  { %2104 = vmatprep.subr.msk.mxu1 %vm2581_vm15, %v3538_v33  ;;  %2106 = vmatprep.mubr.f32.mxu1 %v2496_v48 }
  0xaa   :  { %2057 = vmatmul.mubr.f32.gmra.mxu0 %v2648_v41  ;;  %2105 = vmatpush3.msk.msra.mxu1 %vm2581_vm15, %v3538_v33 }
  0xab   :  { %2107 = vmatmul.mubr.f32.vlgmr.msra.gmra.mxu1 %v2523_v2  ;;  %2059 = vmatprep.mubr.f32.mxu0 %v2656_v6 }
  0xac   :  { %2109 = vmatprep.mubr.f32.mxu1 %v2571_v12 }
  0xae   :  { %2060 = vmatmul.mubr.f32.gmra.mxu0 %v2669_v47 }
  0xaf   :  { %2110 = vmatmul.mubr.f32.gmra.mxu1 %v2598_v8  ;;  %2062 = vmatprep.mubr.f32.mxu0 %v2702_v26 }
  0xb0   :  { %2112 = vmatprep.mubr.f32.mxu1 %v2629_v43 }
  0xb2   :  { %2063 = vmatmul.mubr.f32.gmra.mxu0 %v2705_v1 }
  0xb3   :  { %2113 = vmatmul.mubr.f32.gmra.mxu1 %v2648_v41  ;;  %2065 = vmatprep.mubr.f32.mxu0 %v2725_v17 }
  0xb4   :  { %2115 = vmatprep.mubr.f32.mxu1 %v2656_v6 }
  0xb6   :  { %2066 = vmatmul.mubr.f32.gmra.mxu0 %v2731_v32 }
  0xb7   :  { %2116 = vmatmul.mubr.f32.gmra.mxu1 %v2669_v47  ;;  %2068 = vmatprep.mubr.f32.mxu0 %v2752_v38 }
  0xb8   :  { %2118 = vmatprep.mubr.f32.mxu1 %v2702_v26 }
  0xba   :  { %2069 = vmatmul.mubr.f32.gmra.mxu0 %v2761_v35 }
  0xbb   :  { %2119 = vmatmul.mubr.f32.gmra.mxu1 %v2705_v1  ;;  %2071 = vmatprep.mubr.f32.mxu0 %v2788_v9 }
  0xbc   :  { %2121 = vmatprep.mubr.f32.mxu1 %v2725_v17 }
  0xbe   :  { %2072 = vmatmul.mubr.f32.gmra.mxu0 %v2797_v3 }
  0xbf   :  { %2122 = vmatmul.mubr.f32.gmra.mxu1 %v2731_v32 }
  0xc0   :  { %2124 = vmatprep.mubr.f32.mxu1 %v2752_v38 }
  0xc3   :  { %2125 = vmatmul.mubr.f32.gmra.mxu1 %v2761_v35 }
  0xc4   :  { %2127 = vmatprep.mubr.f32.mxu1 %v2788_v9 }
  0xc7   :  { %2128 = vmatmul.mubr.f32.gmra.mxu1 %v2797_v3 }
 0x103   :  { %v3136_v2 = vpop.f32.mrf.mxu0 }
 0x105   :  { %v3138_v12 = vpop.f32.mrf.mxu0 }
 0x109   :  { %v3140_v30 = vpop.f32.mrf.mxu0 }
 0x10b   :  { %v3142_v41 = vpop.f32.mrf.mxu0 }
 0x10e   :  { %v3144_v51 = vpop.f32.mrf.mxu0 }
 0x10f   :  { %v1884_v57 = vpop.f32.mrf.mxu1 }
 0x110   :  { %v3146_v34 = vpop.f32.mrf.mxu0 }
 0x111   :  { %v568_v48 = vpop.f32.mrf.mxu1 }
 0x113   :  { %v3148_v56 = vpop.f32.mrf.mxu0 }
 0x115   :  { %v3150_v8 = vpop.f32.mrf.mxu0 }
 0x116   :  { %v3152_v43 = vpop.f32.mrf.mxu1 }
 0x118   :  { %v3154_v6 = vpop.f32.mrf.mxu1 }
 0x119   :  { %v3156_v47 = vpop.f32.mrf.mxu0 }
 0x11b   :  { %v3158_v19 = vpop.f32.mrf.mxu0 }
 0x11c   :  { %v3160_v26 = vpop.f32.mrf.mxu1 }
 0x11e   :  { %v3162_v1 = vpop.f32.mrf.mxu1 }
 0x11f   :  { %v3164_v17 = vpop.f32.mrf.mxu0 }
 0x121   :  { %v3166_v32 = vpop.f32.mrf.mxu0 }
 0x122   :  { %v3168_v28 = vpop.f32.mrf.mxu1 }
 0x124   :  { %v3170_v46 = vpop.f32.mrf.mxu1 }
 0x125   :  { %v3172_v33 = vpop.f32.mrf.mxu0 }
 0x127   :  { %v3174_v38 = vpop.f32.mrf.mxu0 }
 0x128   :  { %3569 = vst [vmem:[#allocation24_spill] sm:$0xff] %v3174_v38  ;;  %v3176_v35 = vpop.f32.mrf.mxu1 }
 0x12a   :  { %v3178_v50 = vpop.f32.mrf.mxu1 }
 0x12b   :  { %v3180_v25 = vpop.f32.mrf.mxu0 }
 0x12c   :  { %3570 = vst [vmem:[#allocation40_spill] sm:$0xff] %v3180_v25 }
 0x12d   :  { %v3184_v9 = vpop.f32.mrf.mxu0 }
 0x12e   :  { %v3182_v23 = vpop.f32.mrf.mxu1  ;;  %3571 = vst [vmem:[#allocation36_spill] sm:$0xff] %v3184_v9  ;;  %v575_v9 = vadd.f32 %v1884_v57, %v3136_v2  ;;  %v3589_v2 = vmov 0.0  }
 0x130   :  { %v3186_v3 = vpop.f32.mrf.mxu1 }
 0x132   :  { %v1940_v37 = vpop.f32.mrf.mxu0 }
 0x133   :  { %v3188_v63 = vpop.f32.mrf.mxu1 }
 0x134   :  { %3572 = vst [vmem:[#allocation25_spill] sm:$0xff] %v3188_v63  ;;  %v762_v7 = vpop.f32.mrf.mxu0 }
 0x135   :  { %v3190_v42 = vpop.f32.mrf.mxu1 }
 0x136   :  { %3573 = vst [vmem:[#allocation38_spill] sm:$0xff] %v3190_v42  ;;  %v3593_v42 = vld [vmem:[#allocation20_spill] sm:$0xff] }
 0x137   :  { %vm123_vm6 = vcmp.eq.s32.totalorder %v3593_v42, %v3238_v44 }
 0x138   :  { %v1943_v52 = vpop.f32.mrf.mxu0 }
 0x139   :  { %v3192_v61 = vpop.f32.mrf.mxu1 }
 0x13a   :  { %3574 = vst [vmem:[#allocation26_spill] sm:$0xff] %v3192_v61  ;;  %v776_v4 = vpop.f32.mrf.mxu0  ;;  %v569_v61 = vadd.f32 %v568_v48, %v3138_v12  ;;  %v3590_v48 = vld [vmem:[#allocation30_spill] sm:$0xff] }
 0x13b   :  { %v3194_v22 = vpop.f32.mrf.mxu1  ;;  %vm118_vm3 = vcmp.eq.s32.totalorder %v3590_v48, %v3238_v44  ;;  %v605_v48 = vadd.f32 %v3170_v46, %v3150_v8  ;;  %v3595_v8 = vld [vmem:[#allocation18_spill] sm:$0xff]  ;;  %v3596_v46 = vld [vmem:[#allocation19_spill] sm:$0xff] }
 0x13c   :  { %3575 = vst [vmem:[#allocation27_spill] sm:$0xff] %v3194_v22  ;;  %vm125_vm8 = vcmp.eq.s32.totalorder %v3595_v8, %v3238_v44  ;;  %vm124_vm9 = vcmp.eq.s32.totalorder %v3596_v46, %v3238_v44 }
 0x13e   :  { %v3196_v29 = vpop.f32.mrf.mxu0 }
 0x13f   :  { %v1996_v31 = vpop.f32.mrf.mxu1 }
 0x140   :  { %v3198_v40 = vpop.f32.mrf.mxu0 }
 0x141   :  { %v956_v59 = vpop.f32.mrf.mxu1 }
 0x143   :  { %v3200_v10 = vpop.f32.mrf.mxu0 }
 0x145   :  { %v3202_v20 = vpop.f32.mrf.mxu0 }
 0x146   :  { %v1999_v54 = vpop.f32.mrf.mxu1 }
 0x148   :  { %v972_v39 = vpop.f32.mrf.mxu1 }
 0x149   :  { %v3204_v5 = vpop.f32.mrf.mxu0 }
 0x14b   :  { %v3206_v55 = vpop.f32.mrf.mxu0 }
 0x14c   :  { %v3208_v13 = vpop.f32.mrf.mxu1 }
 0x14e   :  { %v3210_v60 = vpop.f32.mrf.mxu1 }
 0x14f   :  { %v3212_v14 = vpop.f32.mrf.mxu0 }
 0x151   :  { %v3214_v0 = vpop.f32.mrf.mxu0 }
 0x152   :  { %v3216_v15 = vpop.f32.mrf.mxu1 }
 0x154   :  { %v3218_v62 = vpop.f32.mrf.mxu1 }
 0x155   :  { %v3220_v16 = vpop.f32.mrf.mxu0 }
 0x156   :  { %3576 = vst [vmem:[#allocation28_spill] sm:$0xff] %v3220_v16  ;;  %v770_v16 = vadd.f32 %v1940_v37, %v575_v9  ;;  %v581_v9 = vadd.f32 %v3154_v6, %v3142_v41  ;;  %v599_v6 = vadd.f32 %v3160_v26, %v3144_v51 }
 0x157   :  { %v3222_v45 = vpop.f32.mrf.mxu0 }
 0x158   :  { %3577 = vst [vmem:[#allocation31_spill] sm:$0xff] %v3222_v45  ;;  %v3224_v18 = vpop.f32.mrf.mxu1  ;;  %v965_v37 = vadd.f32 %v1996_v31, %v770_v16  ;;  %v593_v31 = vadd.f32 %v3162_v1, %v3146_v34  ;;  %v1540_v16 = vsel %vm118_vm3, 1.0, %v3589_v2  ;;  %v3292_v1 = vsel %vm123_vm6, 1.0, %v3589_v2 }
 0x15a   :  { %v3226_v11 = vpop.f32.mrf.mxu1 }
 0x15b   :  { %v3228_v24 = vpop.f32.mrf.mxu0 }
 0x15c   :  { %3578 = vst [vmem:[#allocation33_spill] sm:$0xff] %v3228_v24  ;;  %v3584_v24 = vld [vmem:[#allocation32_spill] sm:$0xff] }
 0x15d   :  { %v3232_v27 = vpop.f32.mrf.mxu0  ;;  %vm117_vm0 = vcmp.eq.s32.totalorder %v3584_v24, %v3238_v44  ;;  %v587_v24 = vadd.f32 %v3152_v43, %v3140_v30  ;;  %v777_v30 = vadd.f32 %v776_v4, %v581_v9  ;;  %v798_v9 = vadd.f32 %v3196_v29, %v599_v6 }
 0x15e   :  { %v3230_v49 = vpop.f32.mrf.mxu1  ;;  %3580 = vst [vmem:[#allocation35_spill] sm:$0xff] %v3232_v27  ;;  %v3585_v27 = vld [vmem:[#allocation11_spill] sm:$0xff]  ;;  %v1539_v57 = vsel %vm117_vm0, 1.0, %v3589_v2 }
 0x15f   :  { %3579 = vst [vmem:[#allocation34_spill] sm:$0xff] %v3230_v49  ;;  %vm116_vm1 = vcmp.eq.s32.totalorder %v3585_v27, %v3238_v44  ;;  %v3587_v49 = vld [vmem:[#allocation29_spill] sm:$0xff]  ;;  %v784_v38 = vadd.f32 %v1943_v52, %v587_v24  ;;  %v973_v4 = vadd.f32 %v972_v39, %v777_v30 }
 0x160   :  { %v3234_v21 = vpop.f32.mrf.mxu1  ;;  %vm119_vm2 = vcmp.eq.s32.totalorder %v3587_v49, %v3238_v44  ;;  %v1538_v12 = vsel %vm116_vm1, 1.0, %v3589_v2 }
 0x161   :  { %3581 = vst [vmem:[#allocation37_spill] sm:$0xff] %v3234_v21  ;;  %v1541_v49 = vsel %vm119_vm2, 1.0, %v3589_v2  ;;  %v981_v52 = vadd.f32 %v1999_v54, %v784_v38  ;;  %v791_v38 = vadd.f32 %v3198_v40, %v593_v31 }
 0x162   :  { %v2052_v36 = vpop.f32.mrf.mxu0 }
 0x163   :  { %v3236_v53 = vpop.f32.mrf.mxu1  ;;  %v1202_v43 = vadd.f32 %v2052_v36, %v965_v37  ;;  %v989_v40 = vadd.f32 %v3210_v60, %v791_v38 }
 0x164   :  { %3582 = vst [vmem:[#allocation39_spill] sm:$0xff] %v3236_v53  ;;  %v1195_v58 = vpop.f32.mrf.mxu0  ;;  %v763_v53 = vadd.f32 %v762_v7, %v569_v61 }
 0x165   :  { %v3240_v22 = vpop.f32.mrf.mxu1 }
 0x166   :  { %3583 = vst [vmem:[#allocation41_spill] sm:$0xff] %v3240_v22  ;;  %v2055_v25 = vpop.f32.mrf.mxu0  ;;  %v957_v7 = vadd.f32 %v956_v59, %v763_v53  ;;  %v3594_v53 = vld [vmem:[#allocation21_spill] sm:$0xff] }
 0x167   :  { %v3248_v45 = vpop.f32.mrf.mxu1  ;;  %vm122_vm7 = vcmp.eq.s32.totalorder %v3594_v53, %v3238_v44 }
 0x168   :  { %3586 = vst [vmem:[#allocation42_spill] sm:$0xff] %v3248_v45  ;;  %v1207_v21 = vpop.f32.mrf.mxu0  ;;  %v3592_v45 = vld [vmem:[#allocation23_spill] sm:$0xff]  ;;  %v1196_v63 = vadd.f32 %v1195_v58, %v957_v7  ;;  %v1544_v42 = vsel %vm122_vm7, 1.0, %v3589_v2 }
 0x169   :  { %v3252_v22 = vpop.f32.mrf.mxu1  ;;  %vm120_vm5 = vcmp.eq.s32.totalorder %v3592_v45, %v3238_v44  ;;  %v1208_v29 = vadd.f32 %v1207_v21, %v973_v4  ;;  %v997_v45 = vadd.f32 %v3208_v13, %v798_v9 }
 0x16a   :  { %3588 = vst [vmem:[#allocation43_spill] sm:$0xff] %v3252_v22  ;;  %v2058_v61 = vpop.f32.mrf.mxu0  ;;  %v3591_v22 = vld [vmem:[#allocation22_spill] sm:$0xff]  ;;  %v1542_v26 = vsel %vm120_vm5, 1.0, %v3589_v2 }
 0x16b   :  { %v2108_v27 = vpop.f32.mrf.mxu1  ;;  %vm121_vm4 = vcmp.eq.s32.totalorder %v3591_v22, %v3238_v44  ;;  %v611_v22 = vadd.f32 %v3168_v28, %v3148_v56  ;;  %v805_v56 = vadd.f32 %v3202_v20, %v605_v48  ;;  %v1226_v13 = vadd.f32 %v2058_v61, %v997_v45 }
 0x16c   :  { %v1219_v41 = vpop.f32.mrf.mxu0  ;;  %v1379_v36 = vadd.f32 %v2108_v27, %v1202_v43  ;;  %v1543_v34 = vsel %vm121_vm4, 1.0, %v3589_v2 }
 0x16d   :  { %v1372_v59 = vpop.f32.mrf.mxu1  ;;  %v812_v27 = vadd.f32 %v3200_v10, %v611_v22  ;;  %v1220_v30 = vadd.f32 %v1219_v41, %v989_v40  ;;  %v617_v10 = vadd.f32 %v3178_v50, %v3158_v19  ;;  %v1005_v31 = vadd.f32 %v3218_v62, %v805_v56  ;;  %v3601_v40 = vld [vmem:[#allocation38_spill] sm:$0xff] }
 0x16e   :  { %v1373_v58 = vadd.f32 %v1372_v59, %v1196_v63  ;;  %v2061_v24 = vpop.f32.mrf.mxu0  ;;  %v1214_v63 = vadd.f32 %v2055_v25, %v981_v52  ;;  %v1467_v25 = vmul.f32 %v1539_v57, %v1379_v36  ;;  %v623_v57 = vadd.f32 %v3176_v35, %v3156_v47 }
 0x16f   :  { %v2111_v51 = vpop.f32.mrf.mxu1  ;;  %v1013_v20 = vadd.f32 %v3216_v15, %v812_v27  ;;  %v1547_v47 = vsel %vm125_vm8, 1.0, %v3589_v2  ;;  %v1546_v19 = vsel %vm124_vm9, 1.0, %v3589_v2 }
 0x170   :  { %v1466_v54 = vmul.f32 %v1538_v12, %v1373_v58  ;;  %v1231_v39 = vpop.f32.mrf.mxu0  ;;  %v1391_v21 = vadd.f32 %v2111_v51, %v1214_v63  ;;  %v826_v41 = vadd.f32 %v3204_v5, %v623_v57  ;;  %v635_v5 = vadd.f32 %v3182_v23, %v3164_v17  ;;  %v3597_v17 = vld [vmem:[#allocation16_spill] sm:$0xff] }
 0x171   :  { %v1384_v37 = vpop.f32.mrf.mxu1  ;;  %v1238_v35 = vadd.f32 %v2061_v24, %v1013_v20  ;;  %v1232_v50 = vadd.f32 %v1231_v39, %v1005_v31  ;;  %vm127_vm10 = vcmp.eq.s32.totalorder %v3597_v17, %v3238_v44  ;;  %v3607_v31 = vld [vmem:[#allocation40_spill] sm:$0xff] }
 0x172   :  { %v1385_v12 = vadd.f32 %v1384_v37, %v1208_v29  ;;  %v2064_v7 = vpop.f32.mrf.mxu0  ;;  %v1482_v43 = vadd.f32 %v1467_v25, %v1466_v54  ;;  %v1469_v53 = vmul.f32 %v1541_v49, %v1391_v21  ;;  %v1029_v9 = vadd.f32 %v3224_v18, %v826_v41  ;;  %v3600_v37 = vld [vmem:[#allocation24_spill] sm:$0xff]  ;;  %v3611_v41 = vld [vmem:[#allocation39_spill] sm:$0xff] }
 0x173   :  { %v2114_v28 = vpop.f32.mrf.mxu1  ;;  %v641_v25 = vadd.f32 %v3601_v40, %v3600_v37 }
 0x174   :  { %v1468_v6 = vmul.f32 %v1540_v16, %v1385_v12  ;;  %v1243_v60 = vpop.f32.mrf.mxu0  ;;  %v1403_v4 = vadd.f32 %v2114_v28, %v1226_v13  ;;  %v819_v16 = vadd.f32 %v3206_v55, %v617_v10  ;;  %v629_v55 = vadd.f32 %v3186_v3, %v3166_v32  ;;  %v3598_v32 = vld [vmem:[#allocation17_spill] sm:$0xff]  ;;  %v3604_v13 = vld [vmem:[#allocation28_spill] sm:$0xff] }
 0x175   :  { %v1396_v59 = vpop.f32.mrf.mxu1  ;;  %vm126_vm11 = vcmp.eq.s32.totalorder %v3598_v32, %v3238_v44  ;;  %v1250_v23 = vadd.f32 %v2064_v7, %v1029_v9  ;;  %v3617_v32 = vld [vmem:[#allocation43_spill] sm:$0xff] }
 0x176   :  { %v1483_v52 = vadd.f32 %v1482_v43, %v1468_v6  ;;  %v1397_v36 = vadd.f32 %v1396_v59, %v1220_v30  ;;  %v2067_v61 = vpop.f32.mrf.mxu0  ;;  %v1021_v51 = vadd.f32 %v3226_v11, %v819_v16  ;;  %v1471_v63 = vmul.f32 %v1543_v34, %v1403_v4  ;;  %v3599_v34 = vld [vmem:[#allocation25_spill] sm:$0xff]  ;;  %v3605_v30 = vld [vmem:[#allocation31_spill] sm:$0xff]  ;;  %v3608_v59 = vld [vmem:[#allocation26_spill] sm:$0xff] }
 0x177   :  { %v2117_v58 = vpop.f32.mrf.mxu1  ;;  %v833_v39 = vadd.f32 %v3214_v0, %v629_v55  ;;  %v647_v45 = vadd.f32 %v3599_v34, %v3172_v33  ;;  %v3603_v0 = vld [vmem:[#allocation37_spill] sm:$0xff]  ;;  %v847_v43 = vadd.f32 %v3605_v30, %v641_v25  ;;  %v1548_v33 = vsel %vm126_vm11, 1.0, %v3589_v2  ;;  %v3610_v4 = vld [vmem:[#allocation27_spill] sm:$0xff]  ;;  %v3619_v25 = vld [vmem:[#allocation12_spill] sm:$0xff] }
 0x178   :  { %v1470_v15 = vmul.f32 %v1542_v26, %v1397_v36  ;;  %v1484_v62 = vadd.f32 %v1483_v52, %v1469_v53  ;;  %v1255_v49 = vpop.f32.mrf.mxu0  ;;  %v1415_v54 = vadd.f32 %v2117_v58, %v1238_v35  ;;  %v840_v26 = vadd.f32 %v3212_v14, %v635_v5  ;;  %v3602_v14 = vld [vmem:[#allocation34_spill] sm:$0xff]  ;;  %v3609_v52 = vld [vmem:[#allocation36_spill] sm:$0xff]  ;;  %v3612_v58 = vld [vmem:[#allocation41_spill] sm:$0xff] }
 0x179   :  { %v1408_v38 = vpop.f32.mrf.mxu1  ;;  %v1244_v3 = vadd.f32 %v1243_v60, %v1021_v51  ;;  %v1037_v12 = vadd.f32 %v3603_v0, %v833_v39  ;;  %v3606_v60 = vld [vmem:[#allocation15_spill] sm:$0xff]  ;;  %v659_v53 = vadd.f32 %v3608_v59, %v3607_v31  ;;  %v653_v36 = vadd.f32 %v3610_v4, %v3609_v52  ;;  %v3616_v39 = vld [vmem:[#allocation42_spill] sm:$0xff] }
 0x17a   :  { %v1485_v29 = vadd.f32 %v1484_v62, %v1470_v15  ;;  %v1409_v22 = vadd.f32 %v1408_v38, %v1232_v50  ;;  %v2070_v24 = vpop.f32.mrf.mxu0  ;;  %v1045_v21 = vadd.f32 %v3602_v14, %v840_v26  ;;  %v1473_v28 = vmul.f32 %v3292_v1, %v1415_v54 }
 0x17b   :  { %v2120_v48 = vpop.f32.mrf.mxu1  ;;  %vm128_vm12 = vcmp.eq.s32.totalorder %v3606_v60, %v3238_v44  ;;  %v1256_v10 = vadd.f32 %v1255_v49, %v1037_v12  ;;  %v1053_v35 = vadd.f32 %v3612_v58, %v847_v43  ;;  %v1549_v38 = vsel %vm127_vm10, 1.0, %v3589_v2 }
 0x17c   :  { %v1472_v18 = vmul.f32 %v1544_v42, %v1409_v22  ;;  %v1486_v11 = vadd.f32 %v1485_v29, %v1471_v63  ;;  %v1267_v27 = vpop.f32.mrf.mxu0  ;;  %v1427_v46 = vadd.f32 %v2120_v48, %v1250_v23  ;;  %v854_v42 = vadd.f32 %v3604_v13, %v647_v45  ;;  %v3615_v63 = vld [vmem:[#allocation14_spill] sm:$0xff] }
 0x17d   :  { %v1420_v56 = vpop.f32.mrf.mxu1  ;;  %v1262_v57 = vadd.f32 %v2067_v61, %v1045_v21  ;;  %v3613_v61 = vld [vmem:[#allocation33_spill] sm:$0xff]  ;;  %vm129_vm13 = vcmp.eq.s32.totalorder %v3615_v63, %v3238_v44  ;;  %v1268_v22 = vadd.f32 %v1267_v27, %v1053_v35  ;;  %vm131_vm15 = vcmp.eq.s32.totalorder %v3619_v25, %v3238_v44 }
 0x17e   :  { %v1487_v8 = vadd.f32 %v1486_v11, %v1472_v18  ;;  %v1421_v7 = vadd.f32 %v1420_v56, %v1244_v3  ;;  %v1061_v16 = vadd.f32 %v3611_v41, %v854_v42  ;;  %v2073_v50 = vpop.f32.mrf.mxu0  ;;  %v1475_v62 = vmul.f32 %v1547_v47, %v1427_v46  ;;  %v3618_v11 = vld [vmem:[#allocation13_spill] sm:$0xff] }
 0x17f   :  { %v2123_v6 = vpop.f32.mrf.mxu1  ;;  %v868_v49 = vadd.f32 %v3613_v61, %v659_v53  ;;  %v1550_v18 = vsel %vm128_vm12, 1.0, %v3589_v2  ;;  %vm130_vm14 = vcmp.eq.s32.totalorder %v3618_v11, %v3238_v44  ;;  %v1551_v40 = vsel %vm129_vm13, 1.0, %v3589_v2 }
 0x180   :  { %v1474_v20 = vmul.f32 %v1546_v19, %v1421_v7  ;;  %v1488_v1 = vadd.f32 %v1487_v8, %v1473_v28  ;;  %v1439_v55 = vadd.f32 %v2123_v6, %v1262_v57  ;;  %v3614_v19 = vld [vmem:[#allocation35_spill] sm:$0xff]  ;;  %v1274_v54 = vadd.f32 %v2070_v24, %v1061_v16  ;;  %v1279_v3 = vpop.f32.mrf.mxu0 }
 0x181   :  { %v1432_v15 = vpop.f32.mrf.mxu1  ;;  %v861_v51 = vadd.f32 %v3614_v19, %v653_v36  ;;  %v1077_v48 = vadd.f32 %v3616_v39, %v868_v49  ;;  %v1552_v56 = vsel %vm130_vm14, 1.0, %v3589_v2  ;;  %v1553_v42 = vsel %vm131_vm15, 1.0, %v3589_v2 }
 0x182   :  { %v1489_v5 = vadd.f32 %v1488_v1, %v1474_v20  ;;  %v1433_v9 = vadd.f32 %v1432_v15, %v1256_v10  ;;  %v1477_v34 = vmul.f32 %v1549_v38, %v1439_v55 }
 0x183   :  { %v2126_v29 = vpop.f32.mrf.mxu1  ;;  %v1069_v23 = vadd.f32 %v3617_v32, %v861_v51  ;;  %v1286_v21 = vadd.f32 %v2073_v50, %v1077_v48 }
 0x184   :  { %v1476_v26 = vmul.f32 %v1548_v33, %v1433_v9  ;;  %v1490_v47 = vadd.f32 %v1489_v5, %v1475_v62  ;;  %v1451_v24 = vadd.f32 %v2126_v29, %v1274_v54 }
 0x185   :  { %v1444_v17 = vpop.f32.mrf.mxu1  ;;  %v1280_v0 = vadd.f32 %v1279_v3, %v1069_v23 }
 0x186   :  { %v1491_v45 = vadd.f32 %v1490_v47, %v1476_v26  ;;  %v1445_v37 = vadd.f32 %v1444_v17, %v1268_v22  ;;  %v1479_v8 = vmul.f32 %v1551_v40, %v1451_v24 }
 0x187   :  { %v2129_v14 = vpop.f32.mrf.mxu1 }
 0x188   :  { %v1478_v12 = vmul.f32 %v1550_v18, %v1445_v37  ;;  %v1492_v27 = vadd.f32 %v1491_v45, %v1477_v34  ;;  %v1463_v7 = vadd.f32 %v2129_v14, %v1286_v21 }
 0x189   :  { %v1456_v28 = vpop.f32.mrf.mxu1 }
 0x18a   :  { %v1493_v46 = vadd.f32 %v1492_v27, %v1478_v12  ;;  %v1457_v13 = vadd.f32 %v1456_v28, %v1280_v0  ;;  %v1481_v6 = vmul.f32 %v1553_v42, %v1463_v7 }
 0x18c   :  { %v1480_v30 = vmul.f32 %v1552_v56, %v1457_v13  ;;  %v1494_v43 = vadd.f32 %v1493_v46, %v1479_v8 }
 0x18e   :  { %v1495_v33 = vadd.f32 %v1494_v43, %v1480_v30 }
 0x190   :  { %v1496_v60 = vadd.f32 %v1495_v33, %v1481_v6 }
 0x192   :  { %v1497_v44 = vrot.slane %v1496_v60, 4 }
 0x194   :  { %v1498_v57 = vadd.f32 %v1497_v44, %v1496_v60 }
 0x196   :  { %v1499_v10 = vrot.slane %v1498_v57, 2 }
 0x198   :  { %v1500_v20 = vadd.f32 %v1499_v10, %v1498_v57 }
 0x19a   :  { %v1501_v1 = vrot.slane %v1500_v20, 1 }
 0x19c   :  { %v1502_v31 = vadd.f32 %v1501_v1, %v1500_v20 }
 0x19e   :  { %1503 = vst [vmem:[#allocation7] sm:$0x1] %v1502_v31 }
 0x19f   :  { %2188 = shalt.err (!%p2185_p0)
}
 0x1a0   :  { %1513 = dma.vmem_to_hbm [thread:$0]  %s1511_s25, 16, %s3390_s3, [#allocation4]  }
 0x1a1   :  { %2201 = dma.done.wait [#allocation4], 16  }
 0x1a2   :  { %2202 = vsyncadd [#allocation4], 4294967280 }
 0x1a3   :  { %1517 = vsyncpa [#allocation3], 1 }
 0x1a4   :  { %1518 = vsyncpa [#allocation6], 1 }
 0x1a5   :  { %1519 = vsyncpa [#allocation4], 1 }

</bundles_post_ra>
